<compile_context>
chip_gen: v5e
topology: v5e:2x2
jax: 0.10.0
libtpu: 0.0.40
codegen_flags: <defaults>
</compile_context>

<pallas_src>
import functools
import math

import jax
import jax.numpy as jnp
from jax.experimental import pallas as pl
from jax.experimental.pallas import tpu as pltpu

LN_EPS = 1e-5     # torch.nn.LayerNorm default
NEG_INF = -1e30   # f32-safe additive mask value


# ----------------------------- small helpers ------------------------------


def _layer_norm(v, w, b):
    mu = jnp.mean(v, axis=-1, keepdims=True)
    var = jnp.mean(jnp.square(v - mu), axis=-1, keepdims=True)
    return (v - mu) * jax.lax.rsqrt(var + LN_EPS) * w + b


# --------------------- fused token-embedding assembly -----------------------
# One pallas_call builds cat([action_enc, state_enc, patch_embed]) per latent frame directly
# in the token layout (replaces three tiny linears + an XLA concatenate -> saves an HBM pass).


def _assemble_kernel(x_ref, a_ref, s_ref,
                     pew_ref, peb_ref, aw_ref, ab_ref, sw_ref, sb_ref, o_ref):
    o_ref[0, 0:1, :] = (
        jnp.dot(a_ref[0].astype(jnp.bfloat16), aw_ref[...],
                preferred_element_type=jnp.float32) + ab_ref[...])
    o_ref[0, 1:2, :] = (
        jnp.dot(s_ref[0].astype(jnp.bfloat16), sw_ref[...],
                preferred_element_type=jnp.float32) + sb_ref[...])
    o_ref[0, 2:, :] = (
        jnp.dot(x_ref[0].astype(jnp.bfloat16), pew_ref[...],
                preferred_element_type=jnp.float32) + peb_ref[...])


def embed_assemble(x_frames, actions, states, params):
    BT, hw, E = x_frames.shape
    A = actions.shape[-1]
    S = states.shape[-1]
    D = params["pe_w"].shape[1]
    return pl.pallas_call(
        _assemble_kernel,
        grid=(BT,),
        in_specs=[
            pl.BlockSpec((1, hw, E), lambda i: (i, 0, 0)),
            pl.BlockSpec((1, 1, A), lambda i: (i, 0, 0)),
            pl.BlockSpec((1, 1, S), lambda i: (i, 0, 0)),
            pl.BlockSpec((E, D), lambda i: (0, 0)),
            pl.BlockSpec((1, D), lambda i: (0, 0)),
            pl.BlockSpec((A, D), lambda i: (0, 0)),
            pl.BlockSpec((1, D), lambda i: (0, 0)),
            pl.BlockSpec((S, D), lambda i: (0, 0)),
            pl.BlockSpec((1, D), lambda i: (0, 0)),
        ],
        out_specs=pl.BlockSpec((1, 2 + hw, D), lambda i: (i, 0, 0)),
        out_shape=jax.ShapeDtypeStruct((BT, 2 + hw, D), jnp.float32),
        compiler_params=pltpu.CompilerParams(dimension_semantics=("parallel",)),
    )(x_frames, actions, states,
      params["pe_w"], params["pe_b"], params["act_w"], params["act_b"],
      params["st_w"], params["st_b"])


# ------------------------ fused transformer stack ---------------------------


def _stack_block_kernel(num_heads, q_tile,
                        x_ref, fr_ref, fc_ref,
                        ln1w_ref, ln1b_ref, qkvw_ref, qkvb_ref,
                        projw_ref, projb_ref, ln2w_ref, ln2b_ref,
                        fc1w_ref, fc1b_ref, fc2w_ref, fc2b_ref,
                        o_ref, tok_ref):
    """One (batch, layer) grid step.  Token carry lives in tok_ref (VMEM, f32)."""
    layer = pl.program_id(1)
    last_layer = pl.num_programs(1) - 1
    N, D = tok_ref.shape
    H = num_heads
    hd = D // H

    @pl.when(layer == 0)
    def _():
        tok_ref[...] = x_ref[0]

    x = tok_ref[...]                                           # (N, D) f32
    key_frame = fr_ref[...]                                    # (1, N) int32
    query_frame = fc_ref[...]                                  # (N, 1) int32

    # ---- LN + QKV^T for all tokens (K/V stay resident for the q-chunk loop) ----
    xn = _layer_norm(x, ln1w_ref[0], ln1b_ref[0])
    # (3D, N) = W_qkv(out,in) @ xn^T + b ; 1/sqrt(hd) is pre-folded into the Q rows of W/b.
    qkv_t = jax.lax.dot_general(
        qkvw_ref[0], xn.astype(jnp.bfloat16), (((1,), (1,)), ((), ())),
        preferred_element_type=jnp.float32) + qkvb_ref[0]
    qkv_t = qkv_t.reshape(3 * H, hd, N)                        # leading-dim split (layout free)
    q = qkv_t[:H].astype(jnp.bfloat16)                         # (H, hd, N)
    k = qkv_t[H:2 * H].astype(jnp.bfloat16)                    # (H, hd, N)
    v = qkv_t[2 * H:].astype(jnp.bfloat16)                     # (H, hd, N)

    # TODO(synk): ACRoPEAttention applies a 3D rotary embedding to q/k (driven by T/H/W and
    # action_tokens); its source is not part of the provided module, so RoPE is omitted.

    # ---- statically unrolled q-chunk loop: attention + MLP per row chunk ----
    # Bounds activation VMEM to O(q_tile*N + q_tile*4D); residual/MLP are row-local so fusing
    # them per chunk is exact (K/V were built from the pre-attention tokens above).
    for c0 in range(0, N, q_tile):
        rows = min(q_tile, N - c0)
        c1 = c0 + rows

        s = jax.lax.dot_general(
            q[:, :, c0:c1], k, (((1,), (1,)), ((0,), (0,))),
            preferred_element_type=jnp.float32)                # (H, rows, N)

        allowed = key_frame <= query_frame[c0:c1]              # (rows, N) frame-block-causal
        s = jnp.where(allowed, s, NEG_INF)
        s = s - jnp.max(s, axis=-1, keepdims=True)
        p = jnp.exp(s)
        linv = pl.reciprocal(jnp.sum(p, axis=-1), approx=True)  # (H, rows)

        ctx = jax.lax.dot_general(
            v, p.astype(jnp.bfloat16), (((2,), (2,)), ((0,), (0,))),
            preferred_element_type=jnp.float32)                # (H, hd, rows)
        ctx = ctx * linv[:, None, :]                           # deferred softmax normalization

        attn = jax.lax.dot_general(
            ctx.astype(jnp.bfloat16).reshape(D, rows),         # leading-dim merge (layout free)
            projw_ref[0], (((0,), (0,)), ((), ())),
            preferred_element_type=jnp.float32) + projb_ref[0]  # (rows, D)

        xa = x[c0:c1] + attn                                   # post-attention residual rows

        # ---- MLP on the same row chunk ----
        xn2 = _layer_norm(xa, ln2w_ref[0], ln2b_ref[0])
        h1 = jnp.dot(xn2.astype(jnp.bfloat16), fc1w_ref[0],
                     preferred_element_type=jnp.float32) + fc1b_ref[0]
        # TODO(synk): PyTorch nn.GELU() is exact erf GELU; tanh approximation used for portability.
        h1 = jax.nn.gelu(h1, approximate=True)
        mlp = jnp.dot(h1.astype(jnp.bfloat16), fc2w_ref[0],
                      preferred_element_type=jnp.float32) + fc2b_ref[0]

        tok_ref[c0:c1, :] = xa + mlp

    @pl.when(layer == last_layer)
    def _():
        o_ref[0] = tok_ref[...]


def transformer_stack(x, bp, *, num_heads, tokens_per_frame, q_tile=256):
    B, N, D = x.shape
    depth = bp["qkv_wt"].shape[0]
    q_tile = min(q_tile, N)

    # Tiny precomputed frame-id vectors (fetched once: constant index_map); avoids s32 vector
    # division inside the kernel while still building the mask per chunk without an NxN DMA.
    fid = jnp.arange(N, dtype=jnp.int32) // tokens_per_frame
    fr = fid.reshape(1, N)   # frame id of the key token (column)
    fc = fid.reshape(N, 1)   # frame id of the query token (row)

    def wspec(arr):
        return pl.BlockSpec((1,) + tuple(arr.shape[1:]), lambda b, l: (l, 0, 0))

    in_specs = [
        pl.BlockSpec((1, N, D), lambda b, l: (b, 0, 0)),        # tokens (fetched once per b)
        pl.BlockSpec((1, N), lambda b, l: (0, 0)),
        pl.BlockSpec((N, 1), lambda b, l: (0, 0)),
        wspec(bp["ln1_w"]), wspec(bp["ln1_b"]),
        wspec(bp["qkv_wt"]), wspec(bp["qkv_bt"]),
        wspec(bp["proj_w"]), wspec(bp["proj_b"]),
        wspec(bp["ln2_w"]), wspec(bp["ln2_b"]),
        wspec(bp["fc1_w"]), wspec(bp["fc1_b"]),
        wspec(bp["fc2_w"]), wspec(bp["fc2_b"]),
    ]
    # NOTE: on v7x (2 TCs) only the batch axis is "parallel"; B>=2 keeps both cores busy.
    return pl.pallas_call(
        functools.partial(_stack_block_kernel, num_heads, q_tile),
        grid=(B, depth),
        in_specs=in_specs,
        out_specs=pl.BlockSpec((1, N, D), lambda b, l: (b, 0, 0)),
        out_shape=jax.ShapeDtypeStruct((B, N, D), jnp.float32),
        scratch_shapes=[pltpu.VMEM((N, D), jnp.float32)],
        compiler_params=pltpu.CompilerParams(
            dimension_semantics=("parallel", "arbitrary"),
            vmem_limit_bytes=64 * 1024 * 1024),
    )(x, fr, fc,
      bp["ln1_w"], bp["ln1_b"], bp["qkv_wt"], bp["qkv_bt"],
      bp["proj_w"], bp["proj_b"], bp["ln2_w"], bp["ln2_b"],
      bp["fc1_w"], bp["fc1_b"], bp["fc2_w"], bp["fc2_b"])


# ------------- fused cond-token drop + final LayerNorm + projection ---------


def _ln_proj_kernel(cond_tokens, x_ref, lnw_ref, lnb_ref, w_ref, b_ref, o_ref):
    x = x_ref[0]                                              # (cond+hw, D)
    xn = _layer_norm(x[cond_tokens:, :], lnw_ref[...], lnb_ref[...])
    o_ref[0] = (
        jnp.dot(xn.astype(jnp.bfloat16), w_ref[...],
                preferred_element_type=jnp.float32) + b_ref[...]
    ).astype(o_ref.dtype)


def ln_proj_drop(tok_frames, params, *, cond_tokens, embed_dim):
    BT, tpf, D = tok_frames.shape
    hw = tpf - cond_tokens
    return pl.pallas_call(
        functools.partial(_ln_proj_kernel, cond_tokens),
        grid=(BT,),
        in_specs=[
            pl.BlockSpec((1, tpf, D), lambda i: (i, 0, 0)),
            pl.BlockSpec((1, D), lambda i: (0, 0)),
            pl.BlockSpec((1, D), lambda i: (0, 0)),
            pl.BlockSpec((D, embed_dim), lambda i: (0, 0)),
            pl.BlockSpec((1, embed_dim), lambda i: (0, 0)),
        ],
        out_specs=pl.BlockSpec((1, hw, embed_dim), lambda i: (i, 0, 0)),
        out_shape=jax.ShapeDtypeStruct((BT, hw, embed_dim), jnp.float32),
        compiler_params=pltpu.CompilerParams(dimension_semantics=("parallel",)),
    )(tok_frames, params["norm_w"], params["norm_b"], params["out_w"], params["out_b"])


# --------------------------- parameters / config ---------------------------


def trunc_normal(key, shape, std):
    return std * jax.random.truncated_normal(key, -2.0, 2.0, shape, jnp.float32)


def init_params(key, *, embed_dim, pred_dim, depth, num_heads, mlp_ratio,
                action_dim, state_dim, init_std=0.02):
    hidden = int(pred_dim * mlp_ratio)
    head_scale = (pred_dim // num_heads) ** -0.5
    keys = iter(jax.random.split(key, 5 + 4 * depth))

    params = {
        "pe_w": trunc_normal(next(keys), (embed_dim, pred_dim), init_std).astype(jnp.bfloat16),
        "pe_b": jnp.zeros((1, pred_dim), jnp.float32),
        "act_w": trunc_normal(next(keys), (action_dim, pred_dim), init_std).astype(jnp.bfloat16),
        "act_b": jnp.zeros((1, pred_dim), jnp.float32),
        "st_w": trunc_normal(next(keys), (state_dim, pred_dim), init_std).astype(jnp.bfloat16),
        "st_b": jnp.zeros((1, pred_dim), jnp.float32),
        # extrinsics_encoder exists in the module but is unused with use_extrinsics=False
        "ext_w": trunc_normal(next(keys), (action_dim - 1, pred_dim), init_std).astype(jnp.bfloat16),
        "ext_b": jnp.zeros((1, pred_dim), jnp.float32),
    }

    qkv_wt, qkv_bt, proj_w, proj_b = [], [], [], []
    fc1_w, fc1_b, fc2_w, fc2_b = [], [], [], []
    for i in range(depth):
        # _rescale_blocks: divide attn.proj.weight and mlp.fc2.weight by sqrt(2*(layer_id+1))
        rescale = 1.0 / math.sqrt(2.0 * (i + 1))
        # qkv weight in PyTorch (out, in) layout; fold the 1/sqrt(head_dim) attention scale
        # into the Q rows (and Q bias, zero-init here) at prep time -> zero runtime cost.
        w = trunc_normal(next(keys), (3 * pred_dim, pred_dim), init_std)
        w = jnp.concatenate([w[:pred_dim] * head_scale, w[pred_dim:]], axis=0)
        qkv_wt.append(w)
        qkv_bt.append(jnp.zeros((3 * pred_dim, 1), jnp.float32))
        proj_w.append(trunc_normal(next(keys), (pred_dim, pred_dim), init_std) * rescale)
        proj_b.append(jnp.zeros((1, pred_dim), jnp.float32))
        fc1_w.append(trunc_normal(next(keys), (pred_dim, hidden), init_std))
        fc1_b.append(jnp.zeros((1, hidden), jnp.float32))
        fc2_w.append(trunc_normal(next(keys), (hidden, pred_dim), init_std) * rescale)
        fc2_b.append(jnp.zeros((1, pred_dim), jnp.float32))

    params["blk"] = {
        "ln1_w": jnp.ones((depth, 1, pred_dim), jnp.float32),
        "ln1_b": jnp.zeros((depth, 1, pred_dim), jnp.float32),
        "qkv_wt": jnp.stack(qkv_wt).astype(jnp.bfloat16),
        "qkv_bt": jnp.stack(qkv_bt),
        "proj_w": jnp.stack(proj_w).astype(jnp.bfloat16),
        "proj_b": jnp.stack(proj_b),
        "ln2_w": jnp.ones((depth, 1, pred_dim), jnp.float32),
        "ln2_b": jnp.zeros((depth, 1, pred_dim), jnp.float32),
        "fc1_w": jnp.stack(fc1_w).astype(jnp.bfloat16),
        "fc1_b": jnp.stack(fc1_b),
        "fc2_w": jnp.stack(fc2_w).astype(jnp.bfloat16),
        "fc2_b": jnp.stack(fc2_b),
    }
    params["norm_w"] = jnp.ones((1, pred_dim), jnp.float32)
    params["norm_b"] = jnp.zeros((1, pred_dim), jnp.float32)
    params["out_w"] = trunc_normal(next(keys), (pred_dim, embed_dim), init_std).astype(jnp.bfloat16)
    params["out_b"] = jnp.zeros((1, embed_dim), jnp.float32)
    return params


# --------------------------------- forward ---------------------------------


def predictor_ac_forward(params, x, actions, states, *, grid_h, grid_w, num_heads):
    B, n_ctxt, embed_dim = x.shape
    pred_dim = params["pe_w"].shape[1]
    hw = grid_h * grid_w
    T = n_ctxt // hw
    cond_tokens = 2                       # use_extrinsics=False
    tpf = cond_tokens + hw                # tokens per latent frame
    N = T * tpf

    # predictor_embed / action_encoder / state_encoder + cat([a, s, x]) in one kernel
    tok = embed_assemble(
        x.reshape(B * T, hw, embed_dim),
        actions.reshape(B * T, 1, -1),
        states.reshape(B * T, 1, -1),
        params)                                              # (B*T, tpf, pred_dim)
    tok = tok.reshape(B, N, pred_dim)

    # fused transformer stack (frame-block-causal attention, q-chunked)
    tok = transformer_stack(tok, params["blk"], num_heads=num_heads, tokens_per_frame=tpf)

    # drop condition tokens + predictor_norm + predictor_proj in one kernel
    out = ln_proj_drop(tok.reshape(B * T, tpf, pred_dim), params,
                       cond_tokens=cond_tokens, embed_dim=embed_dim)
    return out.reshape(B, T * hw, embed_dim)


# ----------------------------------- main -----------------------------------

if __name__ == "__main__":
    # Small config consistent with the module:
    #   img_size=(32,32), patch_size=16 -> grid 2x2 (HW=4)
    #   num_frames=4, tubelet_size=2    -> T=2 latent frames
    #   embed_dim=32, predictor_embed_dim=64, depth=2, num_heads=4, mlp_ratio=4
    GRID_H = GRID_W = 2
    EMBED_DIM, PRED_DIM = 32, 64
    DEPTH, NUM_HEADS, MLP_RATIO = 2, 4, 4.0
    ACTION_DIM = STATE_DIM = 7
    T, B = 2, 2
    N_CTXT = T * GRID_H * GRID_W  # 8

    root = jax.random.PRNGKey(0)
    kp, kx, ka, ks = jax.random.split(root, 4)

    params = init_params(kp, embed_dim=EMBED_DIM, pred_dim=PRED_DIM, depth=DEPTH,
                         num_heads=NUM_HEADS, mlp_ratio=MLP_RATIO,
                         action_dim=ACTION_DIM, state_dim=STATE_DIM)

    x = jax.random.normal(kx, (B, N_CTXT, EMBED_DIM), jnp.float32)
    actions = jax.random.normal(ka, (B, T, ACTION_DIM), jnp.float32)
    states = jax.random.normal(ks, (B, T, STATE_DIM), jnp.float32)

    out = predictor_ac_forward(params, x, actions, states,
                               grid_h=GRID_H, grid_w=GRID_W, num_heads=NUM_HEADS)
    out = jax.block_until_ready(out)
    assert out.shape == (B, N_CTXT, EMBED_DIM), out.shape
    assert bool(jnp.all(jnp.isfinite(out)))
    print("KERNEL_OK")
</pallas_src>

<mosaic_0001>
module attributes {stable_mosaic.version = 11 : i64} {
  func.func @_assemble_kernel(%arg0: i32, %arg1: memref<1x4x32xf32, #tpu.memory_space<vmem>>, %arg2: memref<1x1x7xf32, #tpu.memory_space<vmem>>, %arg3: memref<1x1x7xf32, #tpu.memory_space<vmem>>, %arg4: memref<32x64xbf16, #tpu.memory_space<vmem>>, %arg5: memref<1x64xf32, #tpu.memory_space<vmem>>, %arg6: memref<7x64xbf16, #tpu.memory_space<vmem>>, %arg7: memref<1x64xf32, #tpu.memory_space<vmem>>, %arg8: memref<7x64xbf16, #tpu.memory_space<vmem>>, %arg9: memref<1x64xf32, #tpu.memory_space<vmem>>, %arg10: memref<1x6x64xf32, #tpu.memory_space<vmem>>) attributes {dimension_semantics = [#tpu.dimension_semantics<parallel>], iteration_bounds = array<i64: 4>, scalar_prefetch = 0 : i64, scratch_operands = 0 : i64, tpu.core_type = #tpu.core_type<tc>, window_params = [{transform_indices = @transform_0, window_bounds = array<i64: 1, 4, 32>}, {transform_indices = @transform_1, window_bounds = array<i64: 1, 1, 7>}, {transform_indices = @transform_2, window_bounds = array<i64: 1, 1, 7>}, {pipeline_mode = #tpu.pipeline_mode<synchronous>, transform_indices = @transform_3, window_bounds = array<i64: 32, 64>}, {pipeline_mode = #tpu.pipeline_mode<synchronous>, transform_indices = @transform_4, window_bounds = array<i64: 1, 64>}, {pipeline_mode = #tpu.pipeline_mode<synchronous>, transform_indices = @transform_5, window_bounds = array<i64: 7, 64>}, {pipeline_mode = #tpu.pipeline_mode<synchronous>, transform_indices = @transform_6, window_bounds = array<i64: 1, 64>}, {pipeline_mode = #tpu.pipeline_mode<synchronous>, transform_indices = @transform_7, window_bounds = array<i64: 7, 64>}, {pipeline_mode = #tpu.pipeline_mode<synchronous>, transform_indices = @transform_8, window_bounds = array<i64: 1, 64>}, {transform_indices = @transform_9, window_bounds = array<i64: 1, 6, 64>}]} {
    %c0 = arith.constant 0 : index
    %c0_0 = arith.constant 0 : index
    %c0_1 = arith.constant 0 : index
    %0 = vector.load %arg2[%c0, %c0_0, %c0_1] : memref<1x1x7xf32, #tpu.memory_space<vmem>>, vector<1x1x7xf32>
    %1 = vector.shape_cast %0 : vector<1x1x7xf32> to vector<1x7xf32>
    %2 = arith.truncf %1 : vector<1x7xf32> to vector<1x7xbf16>
    %c0_2 = arith.constant 0 : index
    %c0_3 = arith.constant 0 : index
    %3 = vector.load %arg6[%c0_2, %c0_3] : memref<7x64xbf16, #tpu.memory_space<vmem>>, vector<7x64xbf16>
    %cst = arith.constant dense<0.000000e+00> : vector<1x64xf32>
    %4 = tpu.matmul %2, %3, %cst {dimension_numbers = #tpu.dot_dimension_numbers<[1], [0], [0], [1], [0, 0, 1, 1], [], []>} : vector<1x7xbf16>, vector<7x64xbf16>, vector<1x64xf32> -> vector<1x64xf32>
    %c0_4 = arith.constant 0 : index
    %c0_5 = arith.constant 0 : index
    %5 = vector.load %arg7[%c0_4, %c0_5] : memref<1x64xf32, #tpu.memory_space<vmem>>, vector<1x64xf32>
    %6 = arith.addf %4, %5 : vector<1x64xf32>
    %c0_6 = arith.constant 0 : index
    %c0_7 = arith.constant 0 : index
    %c0_8 = arith.constant 0 : index
    %7 = vector.load %arg10[%c0_6, %c0_7, %c0_8] : memref<1x6x64xf32, #tpu.memory_space<vmem>>, vector<1x1x64xf32>
    %8 = vector.shape_cast %7 : vector<1x1x64xf32> to vector<1x64xf32>
    %9 = vector.shape_cast %6 : vector<1x64xf32> to vector<1x1x64xf32>
    tpu.vector_store %arg10[%c0_6, %c0_7, %c0_8], %9 {strides = array<i32>} : memref<1x6x64xf32, #tpu.memory_space<vmem>>, vector<1x1x64xf32>,
    %c0_9 = arith.constant 0 : index
    %c0_10 = arith.constant 0 : index
    %c0_11 = arith.constant 0 : index
    %10 = vector.load %arg3[%c0_9, %c0_10, %c0_11] : memref<1x1x7xf32, #tpu.memory_space<vmem>>, vector<1x1x7xf32>
    %11 = vector.shape_cast %10 : vector<1x1x7xf32> to vector<1x7xf32>
    %12 = arith.truncf %11 : vector<1x7xf32> to vector<1x7xbf16>
    %c0_12 = arith.constant 0 : index
    %c0_13 = arith.constant 0 : index
    %13 = vector.load %arg8[%c0_12, %c0_13] : memref<7x64xbf16, #tpu.memory_space<vmem>>, vector<7x64xbf16>
    %cst_14 = arith.constant dense<0.000000e+00> : vector<1x64xf32>
    %14 = tpu.matmul %12, %13, %cst_14 {dimension_numbers = #tpu.dot_dimension_numbers<[1], [0], [0], [1], [0, 0, 1, 1], [], []>} : vector<1x7xbf16>, vector<7x64xbf16>, vector<1x64xf32> -> vector<1x64xf32>
    %c0_15 = arith.constant 0 : index
    %c0_16 = arith.constant 0 : index
    %15 = vector.load %arg9[%c0_15, %c0_16] : memref<1x64xf32, #tpu.memory_space<vmem>>, vector<1x64xf32>
    %16 = arith.addf %14, %15 : vector<1x64xf32>
    %c0_17 = arith.constant 0 : index
    %c1 = arith.constant 1 : index
    %c0_18 = arith.constant 0 : index
    %17 = vector.load %arg10[%c0_17, %c1, %c0_18] : memref<1x6x64xf32, #tpu.memory_space<vmem>>, vector<1x1x64xf32>
    %18 = vector.shape_cast %17 : vector<1x1x64xf32> to vector<1x64xf32>
    %19 = vector.shape_cast %16 : vector<1x64xf32> to vector<1x1x64xf32>
    tpu.vector_store %arg10[%c0_17, %c1, %c0_18], %19 {strides = array<i32>} : memref<1x6x64xf32, #tpu.memory_space<vmem>>, vector<1x1x64xf32>,
    %c0_19 = arith.constant 0 : index
    %c0_20 = arith.constant 0 : index
    %c0_21 = arith.constant 0 : index
    %20 = vector.load %arg1[%c0_19, %c0_20, %c0_21] : memref<1x4x32xf32, #tpu.memory_space<vmem>>, vector<1x4x32xf32>
    %21 = vector.shape_cast %20 : vector<1x4x32xf32> to vector<4x32xf32>
    %22 = arith.truncf %21 : vector<4x32xf32> to vector<4x32xbf16>
    %c0_22 = arith.constant 0 : index
    %c0_23 = arith.constant 0 : index
    %23 = vector.load %arg4[%c0_22, %c0_23] : memref<32x64xbf16, #tpu.memory_space<vmem>>, vector<32x64xbf16>
    %cst_24 = arith.constant dense<0.000000e+00> : vector<4x64xf32>
    %24 = tpu.matmul %22, %23, %cst_24 {dimension_numbers = #tpu.dot_dimension_numbers<[1], [0], [0], [1], [0, 0, 1, 1], [], []>} : vector<4x32xbf16>, vector<32x64xbf16>, vector<4x64xf32> -> vector<4x64xf32>
    %c0_25 = arith.constant 0 : index
    %c0_26 = arith.constant 0 : index
    %25 = vector.load %arg5[%c0_25, %c0_26] : memref<1x64xf32, #tpu.memory_space<vmem>>, vector<1x64xf32>
    %26 = vector.broadcast %25 : vector<1x64xf32> to vector<4x64xf32>
    %27 = arith.addf %24, %26 : vector<4x64xf32>
    %c0_27 = arith.constant 0 : index
    %c2 = arith.constant 2 : index
    %c0_28 = arith.constant 0 : index
    %28 = vector.load %arg10[%c0_27, %c2, %c0_28] : memref<1x6x64xf32, #tpu.memory_space<vmem>>, vector<1x4x64xf32>
    %29 = vector.shape_cast %28 : vector<1x4x64xf32> to vector<4x64xf32>
    %30 = vector.shape_cast %27 : vector<4x64xf32> to vector<1x4x64xf32>
    tpu.vector_store %arg10[%c0_27, %c2, %c0_28], %30 {strides = array<i32>} : memref<1x6x64xf32, #tpu.memory_space<vmem>>, vector<1x4x64xf32>,
    return
  }
  func.func @transform_0(%arg0: i32) -> (i32, i32, i32) {
    %c0_i32 = arith.constant 0 : i32
    %c0_i32_0 = arith.constant 0 : i32
    %c0_i32_1 = arith.constant 0 : i32
    return %arg0, %c0_i32, %c0_i32_0 : i32, i32, i32
  }
  func.func @transform_1(%arg0: i32) -> (i32, i32, i32) {
    %c0_i32 = arith.constant 0 : i32
    %c0_i32_0 = arith.constant 0 : i32
    %c0_i32_1 = arith.constant 0 : i32
    return %arg0, %c0_i32, %c0_i32_0 : i32, i32, i32
  }
  func.func @transform_2(%arg0: i32) -> (i32, i32, i32) {
    %c0_i32 = arith.constant 0 : i32
    %c0_i32_0 = arith.constant 0 : i32
    %c0_i32_1 = arith.constant 0 : i32
    return %arg0, %c0_i32, %c0_i32_0 : i32, i32, i32
  }
  func.func @transform_3(%arg0: i32) -> (i32, i32) {
    %c0_i32 = arith.constant 0 : i32
    %c0_i32_0 = arith.constant 0 : i32
    %c0_i32_1 = arith.constant 0 : i32
    return %c0_i32, %c0_i32_0 : i32, i32
  }
  func.func @transform_4(%arg0: i32) -> (i32, i32) {
    %c0_i32 = arith.constant 0 : i32
    %c0_i32_0 = arith.constant 0 : i32
    %c0_i32_1 = arith.constant 0 : i32
    return %c0_i32, %c0_i32_0 : i32, i32
  }
  func.func @transform_5(%arg0: i32) -> (i32, i32) {
    %c0_i32 = arith.constant 0 : i32
    %c0_i32_0 = arith.constant 0 : i32
    %c0_i32_1 = arith.constant 0 : i32
    return %c0_i32, %c0_i32_0 : i32, i32
  }
  func.func @transform_6(%arg0: i32) -> (i32, i32) {
    %c0_i32 = arith.constant 0 : i32
    %c0_i32_0 = arith.constant 0 : i32
    %c0_i32_1 = arith.constant 0 : i32
    return %c0_i32, %c0_i32_0 : i32, i32
  }
  func.func @transform_7(%arg0: i32) -> (i32, i32) {
    %c0_i32 = arith.constant 0 : i32
    %c0_i32_0 = arith.constant 0 : i32
    %c0_i32_1 = arith.constant 0 : i32
    return %c0_i32, %c0_i32_0 : i32, i32
  }
  func.func @transform_8(%arg0: i32) -> (i32, i32) {
    %c0_i32 = arith.constant 0 : i32
    %c0_i32_0 = arith.constant 0 : i32
    %c0_i32_1 = arith.constant 0 : i32
    return %c0_i32, %c0_i32_0 : i32, i32
  }
  func.func @transform_9(%arg0: i32) -> (i32, i32, i32) {
    %c0_i32 = arith.constant 0 : i32
    %c0_i32_0 = arith.constant 0 : i32
    %c0_i32_1 = arith.constant 0 : i32
    return %arg0, %c0_i32, %c0_i32_0 : i32, i32, i32
  }
}

</mosaic_0001>

<bundles_post_ra>
// kernel: tpu_custom_call.1
= control target key start
LH: loop header
LB: loop body
LE: loop exit
PB: predicated region body
PF: predicated region fallthrough
CT: control target
= control target key end

     0   :  { %s1266_s0 = inlined_call_operand.hbm [shape: f32[4,4,32], index: 0, kind: input, shape index: {}]   ;;  %s1267_s1 = inlined_call_operand.hbm [shape: f32[4,1,7], index: 1, kind: input, shape index: {}]   ;;  %s1268_s2 = inlined_call_operand.hbm [shape: f32[4,1,7], index: 2, kind: input, shape index: {}]   ;;  %s1269_s3 = inlined_call_operand.hbm [shape: bf16[32,64], index: 3, kind: input, shape index: {}]   ;;  %s1270_s4 = inlined_call_operand.hbm [shape: f32[1,64], index: 4, kind: input, shape index: {}]   ;;  %s1271_s5 = inlined_call_operand.vmem [shape: bf16[7,64], index: 5, kind: input, shape index: {}]   ;;  %s1272_s6 = inlined_call_operand.vmem [shape: f32[1,64], index: 6, kind: input, shape index: {}]   ;;  %s1273_s7 = inlined_call_operand.hbm [shape: bf16[7,64], index: 7, kind: input, shape index: {}]   ;;  %s1274_s8 = inlined_call_operand.vmem [shape: f32[1,64], index: 8, kind: input, shape index: {}]   ;;  %s1275_s9 = inlined_call_operand.vmem [shape: f32[4,6,64], index: 9, kind: output, shape index: {}]  }
   0x1   :  { %1277 = sst [smem:[#allocation18_spill]] %s1267_s1 }
   0x2   :  { %1278 = sst [smem:[#allocation19_spill]] %s1269_s3 }
   0x3   :  { %1279 = sst [smem:[#allocation20_spill]] %s1270_s4 }
   0x4   :  { %14 = vsyncpa [#allocation3], 0 }
   0x5   :  { %16 = vsyncpa [#allocation3 + $0x1], 0 }
   0x6   :  { %17 = vsyncpa [#allocation5], 0 }
   0x7   :  { %19 = vsyncpa [#allocation5 + $0x1], 0 }
   0x8   :  { %20 = vsyncpa [#allocation8], 0 }
   0x9   :  { %21 = vsyncpa [#allocation11], 0  ;;  %s1085_s30 = smov 0   ;;  %s1087_s10 = smov 0  }
   0xa   :  { %s1089_s11 = smov 0   ;;  %s1091_s12 = smov 0  }
   0xb LB: > { %1280 = sst [smem:[#allocation16_spill]] %s1023_s11  ;;  %s1107_s16 = sadd.s32 4294967295, %s1027_s12   ;;  %s1027_s12 = sphi %s1091_s12, %s1293_s12   ;;  %s1023_s11 = sphi %s1089_s11, %s1290_s11   ;;  %s1019_s10 = sphi %s1087_s10, %s1292_s10   ;;  %s1015_s30 = sphi %s1085_s30, %s1291_s30  }
   0xc   : > { %s1281_s3 = sld [smem:[#allocation19_spill]]  ;;  %p689_p0 = scmp.ge.s32.totalorder %s1027_s12, 1 }
   0xd   : > { %p48_p1 = scmp.eq.s32.totalorder %s1107_s16, 0  ;;  %p262_p2 = scmp.lt.s32.totalorder %s1027_s12, 5 }
   0xe   : > { %s1029_s18 = smov [#allocation7]   ;;  %s1030_s21 = smov 64  }
   0xf   : > { %p1112_p3 = pnand %p689_p0, %p262_p2  ;;  %s275_s19 = sshll.u32 %s1029_s18, 4  ;;  %s276_s19 = int_to_ptr.vmem [resolvable:$true] %s275_s19 }
  0x10   : > { %s1031_s22 = smov 4   ;;  %s1127_s23 = sadd.s32 1, %s1027_s12  }
  0x11   : > { %p735_p4 = pneg %p1112_p3  ;;  %s31_s24 = ssub.s32 %s1027_s12, %s1127_s23 }
  0x12   : > { %s273_s15 = sshll.u32 %s1281_s3, 4  ;;  %s34_s25 = sadd.s32 1, %s1023_s11  ;;  %s274_s15 = int_to_ptr.hbm [resolvable:$true] %s273_s15 }
  0x13   : > { %p1120_p5 = pnand %p735_p4, %p48_p1  ;;  %p32_p6 = scmp.eq.s32.totalorder %s31_s24, 0 }
  0x14   : > { %p41_p7 = scmp.ne.s32.totalorder %s1023_s11, %s1019_s10  ;;  %p42_p8 = scmp.eq.s32.totalorder %s1027_s12, 0 }
  0x15   : > { %738 = dma.hbm_to_vmem [thread:$0]  (!%p1120_p5), %s274_s15, 256, %s276_s19, [#allocation8], %s1030_s21, %s1030_s21, %s1031_s22  }
  0x16   : > { %p47_p9 = scmp.ne.s32.totalorder %s1019_s10, %s1015_s30  ;;  %p43_p10 = por %p42_p8, %p41_p7 }
  0x17   : > { %s1137_s26 = scalar_select %p32_p6, %s1023_s11, %s34_s25  }
  0x18   : > { %p1141_p11 = por %p48_p1, %p47_p9  ;;  %p758_p12 = scmp.lt.s32.totalorder %s1027_s12, 4 }
  0x19   : > { %1284 = sst [smem:[#allocation17_spill]] %s1137_s26  ;;  %s1147_s28 = sand.u32 1, %s1023_s11  }
  0x1a   : > { %s341_s29 = sand.u32 1, %s1027_s12   ;;  %p1150_p13 = pnand %p758_p12, %p43_p10 }
  0x1b   : > { %s1287_s1 = sld [smem:[#allocation18_spill]]  ;;  %s344_s18 = scalar_lea.vmem [#allocation4], %s1147_s28 }
  0x1c   : > { %s351_s19 = sshll.u32 %s344_s18, 4  ;;  %s1159_s22 = scalar_lea.sflag [#allocation5], %s341_s29  ;;  %s352_s19 = int_to_ptr.vmem [resolvable:$true] %s351_s19 }
  0x1d   : > { %p835_p2 = pneg %p1150_p13 }
  0x21   : > { %s347_s30 = scalar_lea.hbm %s1287_s1, %s1027_s12  ;;  %s838_s3 = scalar_lea.hbm %s1287_s1, 4 }
  0x22   : > { %s349_s21 = sshll.u32 %s347_s30, 4  ;;  %s350_s21 = int_to_ptr.hbm [resolvable:$true] %s349_s21 }
  0x23   : > { %s831_s24 = sshra.s32 %s350_s21, 4  ;;  %s832_s24 = int_to_ptr.hbm [resolvable:$true] %s831_s24 }
  0x24   : > { %s833_s25 = scalar_lea.hbm %s832_s24, 1  ;;  %p839_p7 = scmp.lt.s32.totalorder %s832_s24, %s1287_s1 }
  0x25   : > { %p834_p0 = scmp.ne.s32.totalorder %s832_s24, %s833_s25  ;;  %p840_p8 = scmp.lt.s32.totalorder %s838_s3, %s833_s25 }
  0x27   : > { %p836_p4 = pnand %p835_p2, %p834_p0  ;;  %p841_p9 = por %p840_p8, %p839_p7 }
  0x29   : > { %p837_p6 = pneg %p836_p4 }
  0x2b   : > { %p842_p10 = pnand %p841_p9, %p837_p6 }
  0x2d   : > { %845 = shalt.err (!%p842_p10)
}
  0x2e   : > { %751 = dma.hbm_to_vmem [thread:$0]  (!%p1150_p13), %s350_s21, 16, %s352_s19, %s1159_s22  }
  0x2f   : > { %s1288_s4 = sld [smem:[#allocation20_spill]]  ;;  %s1032_s15 = smov [#allocation9]  }
  0x30   : > { %s290_s18 = sshll.u32 %s1032_s15, 4  ;;  %s306_s25 = sshll.u32 %s1273_s7, 4  ;;  %s291_s18 = int_to_ptr.vmem [resolvable:$true] %s290_s18  ;;  %s307_s25 = int_to_ptr.hbm [resolvable:$true] %s306_s25 }
  0x31   : > { %s1033_s30 = smov [#allocation10]   ;;  %s694_s19 = sshll.u32 %s1147_s28, 2 }
  0x32   : > { %s308_s1 = sshll.u32 %s1033_s30, 4  ;;  %s695_s26 = sshll.u32 %s1027_s12, 2  ;;  %s309_s1 = int_to_ptr.vmem [resolvable:$true] %s308_s1 }
  0x33   : > { %744 = dma.hbm_to_vmem [thread:$0]  (!%p1120_p5), %s307_s25, 64, %s309_s1, [#allocation11]  }
  0x34   : > { %s330_s15 = scalar_lea.hbm %s1266_s0, %s695_s26  ;;  %s323_s24 = scalar_lea.sflag [#allocation3], %s1147_s28 }
  0x35   : > { %s288_s14 = sshll.u32 %s1288_s4, 4  ;;  %s326_s4 = scalar_lea.vmem [#allocation2], %s694_s19  ;;  %s289_s14 = int_to_ptr.hbm [resolvable:$true] %s288_s14 }
  0x36   : > { %741 = dma.hbm_to_vmem [thread:$0]  (!%p1120_p5), %s289_s14, 16, %s291_s18, [#allocation8]  }
  0x37   : > { %s334_s11 = sshll.u32 %s326_s4, 4  ;;  %s332_s3 = sshll.u32 %s330_s15, 4  ;;  %s335_s11 = int_to_ptr.vmem [resolvable:$true] %s334_s11  ;;  %s333_s3 = int_to_ptr.hbm [resolvable:$true] %s332_s3 }
  0x38   : > { %s921_s14 = sshra.s32 %s333_s3, 4  ;;  %s928_s25 = scalar_lea.hbm %s1266_s0, 16  ;;  %s922_s14 = int_to_ptr.hbm [resolvable:$true] %s921_s14 }
  0x39   : > { %s923_s18 = scalar_lea.hbm %s922_s14, 4  ;;  %p929_p5 = scmp.lt.s32.totalorder %s922_s14, %s1266_s0 }
  0x3a   : > { %p924_p12 = scmp.ne.s32.totalorder %s922_s14, %s923_s18  ;;  %p930_p6 = scmp.lt.s32.totalorder %s928_s25, %s923_s18 }
  0x3c   : > { %p926_p0 = pnand %p924_p12, %p835_p2  ;;  %p931_p7 = por %p930_p6, %p929_p5 }
  0x3e   : > { %p927_p4 = pneg %p926_p0 }
  0x40   : > { %p932_p8 = pnand %p931_p7, %p927_p4 }
  0x42   : > { %935 = shalt.err (!%p932_p8)
}
  0x43   : > { %748 = dma.hbm_to_vmem [thread:$0]  (!%p1150_p13), %s333_s3, 64, %s335_s11, %s323_s24  }
  0x44   : > { %s364_s21 = scalar_lea.hbm %s1268_s2, %s1027_s12  ;;  %s361_s29 = scalar_lea.vmem [#allocation6], %s1147_s28 }
  0x45   : > { %s368_s15 = sshll.u32 %s361_s29, 4  ;;  %s366_s1 = sshll.u32 %s364_s21, 4  ;;  %s369_s15 = int_to_ptr.vmem [resolvable:$true] %s368_s15  ;;  %s367_s1 = int_to_ptr.hbm [resolvable:$true] %s366_s1 }
  0x46   : > { %s951_s14 = sshra.s32 %s367_s1, 4  ;;  %s958_s11 = scalar_lea.hbm %s1268_s2, 4  ;;  %s952_s14 = int_to_ptr.hbm [resolvable:$true] %s951_s14 }
  0x47   : > { %s953_s18 = scalar_lea.hbm %s952_s14, 1  ;;  %p959_p0 = scmp.lt.s32.totalorder %s952_s14, %s1268_s2 }
  0x48   : > { %p954_p9 = scmp.ne.s32.totalorder %s952_s14, %s953_s18  ;;  %p960_p4 = scmp.lt.s32.totalorder %s958_s11, %s953_s18 }
  0x4a   : > { %p956_p10 = pnand %p954_p9, %p835_p2  ;;  %p961_p5 = por %p960_p4, %p959_p0 }
  0x4c   : > { %p957_p12 = pneg %p956_p10 }
  0x4e   : > { %p962_p6 = pnand %p961_p5, %p957_p12 }
  0x50   : > { %965 = shalt.err (!%p962_p6)
}
  0x51   : > { %754 = dma.hbm_to_vmem [thread:$0]  (!%p1150_p13), %s367_s1, 16, %s369_s15, %s1159_s22  }
  0x52   : > { %377 = sbr.rel (%p1112_p3) target bundleno = 244 (0xf4), region = 56  ;;  %s379_s12 = sand.u32 (!%p1112_p3), 1, %s1019_s10  }
  0x53   : > { %s697_s28 = sshll.u32 (!%p1112_p3), %s379_s12, 2  ;;  %s380_s30 = scalar_lea.sflag (!%p1112_p3), [#allocation3], %s379_s12 }
  0x54   : > { %s383_s26 = scalar_lea.vmem (!%p1112_p3), [#allocation2], %s697_s28 }
  0x57   : > { %998 = dma.done.wait (%p1141_p11), %s380_s30, 64  }
  0x58   : > { %1000 = vsyncadd (%p1141_p11), %s380_s30, 4294967232  ;;  %s389_s4 = sand.u32 1, %s1107_s16   ;;  %s392_s19 = scalar_lea.vmem [#allocation4], %s379_s12 }
  0x59   : > { %s390_s13 = scalar_lea.sflag [#allocation5], %s389_s4 }
  0x5a   : > { %1002 = dma.done.wait (%p1141_p11), %s390_s13, 32  }
  0x5b   : > { %1004 = vsyncadd (%p1141_p11), %s390_s13, 4294967264  ;;  %s401_s17 = scalar_lea.vmem [#allocation6], %s379_s12 }
  0x5c   : > { %1006 = dma.done.wait (%p48_p1), [#allocation8], 272  }
  0x5d   : > { %1008 = vsyncadd (%p48_p1), [#allocation8], 4294967024 }
  0x5e   : > { %1010 = dma.done.wait (%p48_p1), [#allocation11], 64  }
  0x5f   : > { %1012 = vsyncadd (%p48_p1), [#allocation11], 4294967232  ;;  %vm472_vm0 = vcmask 1042432   ;;  %vm473_vm1 = vcmask 1043456   ;;  %v1034_v0 = vmov 65535   ;;  %v716_v3 = vld [vmem:[#allocation7 + $0x8] sm:$0xff] }
  0x60   : > { %v474_v1 = vsel %vm472_vm0, 4294967295, %v1034_v0  ;;  %v466_v4 = vld [vmem:[%s1271_s5] sm:$0xf]  ;;  %550 = vmatpush.bf16.msra.mxu2 %v716_v3  ;;  %v715_v10 = vld [vmem:[#allocation7] sm:$0xff]  ;;  %vm468_vm2 = vcmask 56320   ;;  %vm540_vm3 = vcmask 261120  }
  0x61   : > { %v475_v2 = vsel %vm473_vm1, %v474_v1, 0  ;;  %v496_v5 = vld [vmem:[#allocation10] sm:$0xf]  ;;  %p459_p1 = scmp.lt.s32.totalorder %s1107_s16, 3  ;;  %vm492_vm4 = vcmask 516096   ;;  %vm557_vm5 = vcmask 519168  }
  0x62   : > { %v477_v6 = vand.u32 %v475_v2, %v466_v4  ;;  %v502_v7 = vand.u32 %v496_v5, %v475_v2  ;;  %v464_v8 = vld [vmem:[%s392_s19] sm:$0x1]  ;;  %v800_v21 = vld [vmem:[#allocation9] ss:$0 sm:$0xff] }
  0x63   : > { %v494_v9 = vld [vmem:[%s401_s17] sm:$0x1]  ;;  %v465_v11 = vpack.c.bf16 %v464_v8, %v464_v8  ;;  %s1295_s16 = smov (!%p459_p1, %s1107_s16), 3 }
  0x64   : > { %v518_v12 = vld [vmem:[%s383_s26] sm:$0xf]  ;;  %486 = vmatpush.bf16.msra.mxu0 %v477_v6  ;;  %511 = vmatpush.bf16.msra.mxu1 %v502_v7  ;;  %v495_v13 = vpack.c.bf16 %v494_v9, %v494_v9  ;;  %s701_s21 = sshll.u32 %s1295_s16, 3 }
  0x65   : > { %v519_v14 = vpack.c.bf16 %v518_v12, %v518_v12  ;;  %551 = vmatpush.bf16.msra.mxu2 %v715_v10  ;;  %v467_v15 = vld [vmem:[%s1272_s6] sm:$0x1]  ;;  %s462_s25 = scalar_lea.vmem %s1275_s9, %s701_s21 }
  0x66   : > { %v497_v16 = vld [vmem:[%s1274_s8] sm:$0x1] }
  0x67   : > { %702 = vmatmul.msk.bf16.vlgmr.msra.gmra.mxu0 %vm468_vm2, %v465_v11  ;;  %703 = vmatmul.msk.bf16.vlgmr.msra.gmra.mxu1 %vm468_vm2, %v495_v13 }
  0x68   : > { %712 = vmatmul.msk.bf16.vlgmr.msra.gmra.mxu2 %vm540_vm3, %v519_v14 }
  0xe4   : > { %v488_v17 = vpop.f32.mrf.mxu0  ;;  %v513_v19 = vpop.f32.mrf.mxu1 }
  0xe5   : > { %v489_v18 = vadd.f32 %v488_v17, %v467_v15  ;;  %v514_v20 = vadd.f32 %v513_v19, %v497_v16 }
  0xe7   : > { %493 = vst.msk [vmem:[%s462_s25] sm:$0x1] %vm492_vm4, %v489_v18 }
  0xe8   : > { %517 = vst.msk [vmem:[%s462_s25 + $0x1] sm:$0x1] %vm492_vm4, %v514_v20 }
  0xeb   : > { %v553_v24 = vpop.f32.mrf.mxu2 }
  0xec   : > { %v490_v22 = vpop.f32.mrf.mxu0  ;;  %v515_v23 = vpop.f32.mrf.mxu1  ;;  %v554_v25 = vadd.f32 %v800_v21, %v553_v24 }
  0xee   : > { %558 = vst.msk [vmem:[%s462_s25 + $0x2] sm:$0xf] %vm557_vm5, %v554_v25 }
  0xf3   : > { %v555_v26 = vpop.f32.mrf.mxu2 }
  0xf4 PF: > { %s1289_s16 = sld [smem:[#allocation16_spill]]  ;;  %p24_p3 = scmp.ge.s32.totalorder %s1127_s23, 6  }
  0xf5   : > { %s1290_s11 = sld [smem:[#allocation17_spill]]  ;;  %s1291_s30 = smov %s1019_s10 }
  0xf6   : > { %s1293_s12 = smov %s1127_s23  ;;  %26 = sbr.rel (!%p24_p3) target bundleno = 11 (0xb), region = 132 }
  0xfa   : > { %s1292_s10 = smov %s1289_s16 }
  0xfb   :  { %578 = vsyncpa [#allocation3], 1 }
  0xfc   :  { %580 = vsyncpa [#allocation3 + $0x1], 1 }
  0xfd   :  { %581 = vsyncpa [#allocation5], 1 }
  0xfe   :  { %583 = vsyncpa [#allocation5 + $0x1], 1 }
  0xff   :  { %584 = vsyncpa [#allocation8], 1 }
 0x100   :  { %585 = vsyncpa [#allocation11], 1 }

</bundles_post_ra>
